<compile_context>
chip_gen: v7x
topology: tpu7x:2x2x1
jax: 0.10.0
libtpu: 0.0.40
codegen_flags: <defaults>
</compile_context>

<pallas_src>
import functools

import jax
import jax.numpy as jnp
import numpy as np
from jax import lax
from jax.experimental import pallas as pl
from jax.experimental.pallas import tpu as pltpu

ALPHA = 0.25
GAMMA = 2.0
SIZE_AVERAGE = True
_INV_LN2 = 1.0 / float(np.log(2.0))


def _focal_kernel(gt_ref, pred_ref, out_ref, *, alpha, gamma, C, HW, T_HW, need_mask):
    # Native-dtype tiles straight off the DMA; cast to f32 in VMEM.
    gt = gt_ref[...].astype(jnp.float32)        # (1, C,  S_t, 128)
    pred = pred_ref[...].astype(jnp.float32)    # (1, 2C, S_t, 128)

    # Channel split on a leading (non-tiled) axis: zero-cost views.
    p_top = pred[:, :C]                         # pairs with gt
    p_bot = pred[:, C:]                         # pairs with (1 - gt)

    # pt = sum_c( gt*p_top + (1-gt)*p_bot ) == sum_c( gt*(p_top - p_bot) + p_bot )
    pt = jnp.sum(gt * (p_top - p_bot) + p_bot, axis=1)      # (1, S_t, 128)

    # clip_by_tensor(pt, 1e-12, 1.0) -- only for the log argument, as in torch.
    ptc = jnp.clip(pt, 1e-12, 1.0)

    one_minus = 1.0 - pt
    if float(gamma).is_integer():
        powv = lax.integer_pow(one_minus, int(gamma))       # avoid exp/log path
    else:
        powv = jnp.power(one_minus, gamma)

    coef = jnp.float32(-alpha * _INV_LN2)                   # fold -alpha and 1/ln2
    focal = coef * powv * jnp.log(ptc)                      # (1, S_t, 128)

    if need_mask:  # zero positions past H*W (pad tail / partial last tile)
        t_idx = pl.program_id(1)
        s_iota = lax.broadcasted_iota(jnp.int32, focal.shape, 1)
        l_iota = lax.broadcasted_iota(jnp.int32, focal.shape, 2)
        pos = t_idx * T_HW + s_iota * 128 + l_iota
        focal = jnp.where(pos < HW, focal, 0.0)

    # Dense per-step partial sum: (S_t, 128) -> (S_t//8, 8, 128) is vreg-aligned
    # (free), the axis-0 sum is plain full-vreg VPU adds, and the store is an
    # unmasked lane-dense (8, 128) block owned only by this grid step.
    s_t = focal.shape[1]
    partial = jnp.sum(focal.reshape(s_t // 8, 8, 128), axis=0)      # (8, 128)
    out_ref[...] = partial.reshape(1, 1, 8, 128)


def focal_loss_pallas(pred, gt, alpha=ALPHA, gamma=GAMMA, size_average=SIZE_AVERAGE,
                      vmem_budget_bytes=32 << 20, vmem_limit_bytes=48 << 20):
    """pred: [B, 2C, H, W] probabilities, gt: [B, C, H, W]; any float/int/bool dtypes."""
    B, C2, H, W = pred.shape
    C = gt.shape[1]
    assert C2 == 2 * C, (C2, C)
    HW = H * W

    # Fold HW into a dense (sublane, lane) pair: [..., S, 128] with S % 8 == 0.
    # Free reshape when H*W is a multiple of 1024; otherwise one pad copy
    # (the padded tail is masked out in the kernel).
    HW_pad = ((HW + 1023) // 1024) * 1024
    S = HW_pad // 128
    pred3 = pred.reshape(B, C2, HW)
    gt3 = gt.reshape(B, C, HW)
    if HW_pad != HW:
        pad = HW_pad - HW
        pred3 = jnp.pad(pred3, ((0, 0), (0, 0), (0, pad)))
        gt3 = jnp.pad(gt3, ((0, 0), (0, 0), (0, pad)))
    pred4 = pred3.reshape(B, C2, S, 128)
    gt4 = gt3.reshape(B, C, S, 128)

    # Tile the S axis.  Size it from *resident VMEM* bytes per sublane-row of a
    # tile: double-buffered native-dtype input tiles plus the in-kernel f32
    # copies / intermediates (~ 4C + 4 f32 rows).
    gt_item = gt.dtype.itemsize
    pred_item = pred.dtype.itemsize
    bytes_per_row = (2 * 128 * C * (gt_item + 2 * pred_item)   # 2x-buffered DMA tiles
                     + 128 * 4 * (4 * C + 4))                  # f32 intermediates
    S_t = (vmem_budget_bytes // bytes_per_row) // 8 * 8
    S_t = int(max(8, min(S_t, S)))
    n_t = pl.cdiv(S, S_t)

    # v7x megacore: make sure there are >= 2 grid steps to shard when possible.
    if B * n_t < 2 and S >= 16:
        S_t = int(max(8, (S // 2) // 8 * 8))
        n_t = pl.cdiv(S, S_t)

    T_HW = S_t * 128
    need_mask = (n_t * T_HW) != HW

    kernel = functools.partial(
        _focal_kernel, alpha=float(alpha), gamma=float(gamma),
        C=C, HW=HW, T_HW=T_HW, need_mask=need_mask)

    cost = pl.CostEstimate(
        flops=int(B * HW_pad * (3 * C + 6)),
        transcendentals=int(B * HW_pad),
        bytes_accessed=int(B * HW_pad * C * (gt_item + 2 * pred_item)
                           + B * n_t * 8 * 128 * 4),
    )

    partials = pl.pallas_call(
        kernel,
        out_shape=jax.ShapeDtypeStruct((B, n_t, 8, 128), jnp.float32),
        grid_spec=pltpu.PrefetchScalarGridSpec(
            num_scalar_prefetch=0,
            grid=(B, n_t),
            in_specs=[
                pl.BlockSpec((1, C, S_t, 128), lambda b, t: (b, 0, t, 0)),
                pl.BlockSpec((1, C2, S_t, 128), lambda b, t: (b, 0, t, 0)),
            ],
            out_specs=pl.BlockSpec((1, 1, 8, 128), lambda b, t: (b, t, 0, 0)),
        ),
        compiler_params=pltpu.CompilerParams(
            dimension_semantics=("parallel", "parallel"),
            vmem_limit_bytes=int(vmem_limit_bytes),
        ),
        cost_estimate=cost,
    )(gt4, pred4)

    total = jnp.sum(partials)                   # tiny partial array; reduced by XLA
    if size_average:
        total = total / jnp.float32(B * HW)     # mean over the original B*H*W
    return total


def focal_loss_ref(pred, gt, alpha=ALPHA, gamma=GAMMA, size_average=SIZE_AVERAGE):
    """Pure-JAX reference mirroring the PyTorch module."""
    gt = gt.astype(jnp.float32)
    pred = pred.astype(jnp.float32)
    gt_oh = jnp.concatenate((gt, 1.0 - gt), axis=1)
    pt = jnp.sum(gt_oh * pred, axis=1)
    ptc = jnp.clip(pt, 1e-12, 1.0)
    focal = -alpha * jnp.power(1.0 - pt, gamma) * (jnp.log(ptc) / np.log(2.0))
    return jnp.mean(focal) if size_average else jnp.sum(focal)


if __name__ == "__main__":
    key = jax.random.PRNGKey(0)

    ok = True
    for (B, C, H, W) in [(2, 2, 16, 16),     # H*W = 256: exercises pad + tail mask
                         (1, 1, 32, 32)]:    # H*W = 1024: dense layout, no padding
        key, k1, k2 = jax.random.split(key, 3)
        p_top = jax.nn.sigmoid(jax.random.normal(k1, (B, C, H, W), dtype=jnp.float32))
        pred = jnp.concatenate([p_top, 1.0 - p_top], axis=1)        # [B, 2C, H, W]
        gt = jax.random.bernoulli(k2, 0.5, (B, C, H, W)).astype(jnp.float32)

        loss = jax.block_until_ready(focal_loss_pallas(pred, gt))
        ref = jax.block_until_ready(focal_loss_ref(pred, gt))
        ok &= bool(np.allclose(np.asarray(loss), np.asarray(ref), rtol=1e-5, atol=1e-6))

    assert ok
    print("KERNEL_OK")
</pallas_src>

<mosaic_0001>
module attributes {stable_mosaic.version = 11 : i64} {
  func.func @_focal_kernel(%arg0: i32, %arg1: i32, %arg2: memref<1x2x8x128xf32, #tpu.memory_space<vmem>>, %arg3: memref<1x4x8x128xf32, #tpu.memory_space<vmem>>, %arg4: memref<1x1x8x128xf32, #tpu.memory_space<vmem>>) attributes {dimension_semantics = [#tpu.dimension_semantics<parallel>, #tpu.dimension_semantics<parallel>], iteration_bounds = array<i64: 2, 1>, scalar_prefetch = 0 : i64, scratch_operands = 0 : i64, tpu.core_type = #tpu.core_type<tc>, window_params = [{transform_indices = @transform_0, window_bounds = array<i64: 1, 2, 8, 128>}, {transform_indices = @transform_1, window_bounds = array<i64: 1, 4, 8, 128>}, {transform_indices = @transform_2, window_bounds = array<i64: 1, 1, 8, 128>}]} {
    %c0 = arith.constant 0 : index
    %c0_0 = arith.constant 0 : index
    %c0_1 = arith.constant 0 : index
    %c0_2 = arith.constant 0 : index
    %0 = vector.load %arg2[%c0, %c0_0, %c0_1, %c0_2] : memref<1x2x8x128xf32, #tpu.memory_space<vmem>>, vector<1x2x8x128xf32>
    %c0_3 = arith.constant 0 : index
    %c0_4 = arith.constant 0 : index
    %c0_5 = arith.constant 0 : index
    %c0_6 = arith.constant 0 : index
    %1 = vector.load %arg3[%c0_3, %c0_4, %c0_5, %c0_6] : memref<1x4x8x128xf32, #tpu.memory_space<vmem>>, vector<1x4x8x128xf32>
    %2 = vector.extract_strided_slice %1 {offsets = [0, 0, 0, 0], sizes = [1, 2, 8, 128], strides = [1, 1, 1, 1]} : vector<1x4x8x128xf32> to vector<1x2x8x128xf32>
    %3 = vector.extract_strided_slice %1 {offsets = [0, 2, 0, 0], sizes = [1, 2, 8, 128], strides = [1, 1, 1, 1]} : vector<1x4x8x128xf32> to vector<1x2x8x128xf32>
    %4 = arith.subf %2, %3 : vector<1x2x8x128xf32>
    %5 = arith.mulf %0, %4 : vector<1x2x8x128xf32>
    %6 = arith.addf %5, %3 : vector<1x2x8x128xf32>
    %cst = arith.constant dense<0.000000e+00> : vector<1x8x128xf32>
    %7 = vector.multi_reduction <add>, %6, %cst [1] : vector<1x2x8x128xf32> to vector<1x8x128xf32>
    %cst_7 = arith.constant 9.99999996E-13 : f32
    %cst_8 = arith.constant 1.000000e+00 : f32
    %8 = vector.broadcast %cst_7 : f32 to vector<1x8x128xf32>
    %9 = arith.maximumf %8, %7 : vector<1x8x128xf32>
    %10 = vector.broadcast %cst_8 : f32 to vector<1x8x128xf32>
    %11 = arith.minimumf %10, %9 : vector<1x8x128xf32>
    %cst_9 = arith.constant 1.000000e+00 : f32
    %12 = vector.broadcast %cst_9 : f32 to vector<1x8x128xf32>
    %13 = arith.subf %12, %7 : vector<1x8x128xf32>
    %14 = arith.mulf %13, %13 : vector<1x8x128xf32>
    %cst_10 = arith.constant -0.360673755 : f32
    %15 = vector.broadcast %cst_10 : f32 to vector<1x8x128xf32>
    %16 = arith.mulf %15, %14 : vector<1x8x128xf32>
    %17 = math.log %11 : vector<1x8x128xf32>
    %18 = arith.mulf %16, %17 : vector<1x8x128xf32>
    %19 = tpu.iota {dimensions = array<i32: 1>} : vector<1x8x128xi32>
    %20 = tpu.iota {dimensions = array<i32: 2>} : vector<1x8x128xi32>
    %c1024_i32 = arith.constant 1024 : i32
    %21 = arith.muli %arg1, %c1024_i32 : i32
    %c128_i32 = arith.constant 128 : i32
    %22 = vector.broadcast %c128_i32 : i32 to vector<1x8x128xi32>
    %23 = arith.muli %19, %22 : vector<1x8x128xi32>
    %24 = vector.broadcast %21 : i32 to vector<1x8x128xi32>
    %25 = arith.addi %24, %23 : vector<1x8x128xi32>
    %26 = arith.addi %25, %20 : vector<1x8x128xi32>
    %c256_i32 = arith.constant 256 : i32
    %27 = vector.broadcast %c256_i32 : i32 to vector<1x8x128xi32>
    %28 = arith.cmpi slt, %26, %27 : vector<1x8x128xi32>
    %cst_11 = arith.constant 0.000000e+00 : f32
    %29 = vector.broadcast %cst_11 : f32 to vector<1x8x128xf32>
    %30 = arith.select %28, %18, %29 : vector<1x8x128xi1>, vector<1x8x128xf32>
    %cst_12 = arith.constant dense<0.000000e+00> : vector<8x128xf32>
    %31 = vector.multi_reduction <add>, %30, %cst_12 [0] : vector<1x8x128xf32> to vector<8x128xf32>
    %32 = vector.shape_cast %31 : vector<8x128xf32> to vector<1x1x8x128xf32>
    %c0_13 = arith.constant 0 : index
    %c0_14 = arith.constant 0 : index
    %c0_15 = arith.constant 0 : index
    %c0_16 = arith.constant 0 : index
    %33 = vector.load %arg4[%c0_13, %c0_14, %c0_15, %c0_16] : memref<1x1x8x128xf32, #tpu.memory_space<vmem>>, vector<1x1x8x128xf32>
    tpu.vector_store %arg4[%c0_13, %c0_14, %c0_15, %c0_16], %32 {strides = array<i32>} : memref<1x1x8x128xf32, #tpu.memory_space<vmem>>, vector<1x1x8x128xf32>,
    return
  }
  func.func @transform_0(%arg0: i32, %arg1: i32) -> (i32, i32, i32, i32) {
    %c0_i32 = arith.constant 0 : i32
    %c0_i32_0 = arith.constant 0 : i32
    %c0_i32_1 = arith.constant 0 : i32
    return %arg0, %c0_i32, %arg1, %c0_i32_0 : i32, i32, i32, i32
  }
  func.func @transform_1(%arg0: i32, %arg1: i32) -> (i32, i32, i32, i32) {
    %c0_i32 = arith.constant 0 : i32
    %c0_i32_0 = arith.constant 0 : i32
    %c0_i32_1 = arith.constant 0 : i32
    return %arg0, %c0_i32, %arg1, %c0_i32_0 : i32, i32, i32, i32
  }
  func.func @transform_2(%arg0: i32, %arg1: i32) -> (i32, i32, i32, i32) {
    %c0_i32 = arith.constant 0 : i32
    %c0_i32_0 = arith.constant 0 : i32
    %c0_i32_1 = arith.constant 0 : i32
    return %arg0, %arg1, %c0_i32, %c0_i32_0 : i32, i32, i32, i32
  }
}

</mosaic_0001>

<bundles_post_ra>
// kernel: tpu_custom_call.1
= control target key start
LH: loop header
LB: loop body
LE: loop exit
PB: predicated region body
PF: predicated region fallthrough
CT: control target
= control target key end

     0   :  { %7 = vsyncpa [#allocation3], 0  ;;  %s866_s0 = inlined_call_operand.hbm [shape: f32[2,2,8,128], index: 0, kind: input, shape index: {}]   ;;  %s867_s1 = inlined_call_operand.hbm [shape: f32[2,4,8,128], index: 1, kind: input, shape index: {}]   ;;  %s868_s2 = inlined_call_operand.hbm [shape: f32[2,1,8,128], index: 2, kind: output, shape index: {}]  }
   0x1   :  { %9 = vsyncpa [#allocation3 + $0x1], 0 }
   0x2   :  { %10 = vsyncpa [#allocation6], 0 }
   0x3   :  { %12 = vsyncpa [#allocation6 + $0x1], 0 }
   0x4   :  { %13 = vsyncpa [#allocation4], 0 }
   0x5   :  { %15 = vsyncpa [#allocation4 + $0x1], 0  ;;  %s636_s9 = smov 0   ;;  %s638_s10 = smov 0  }
   0x6   :  { %s640_s11 = smov 0   ;;  %s642_s12 = smov 0  }
   0x7   :  { %s644_s13 = smov 0   ;;  %s646_s14 = smov 0  }
   0x8 LB: > { %s377_s15 = sadd.s32 4294967295, %s614_s14   ;;  %s378_s16 = sadd.s32 4294967294, %s614_s14   ;;  %s614_s14 = sphi %s646_s14, %s21_s14   ;;  %s610_s13 = sphi %s644_s13, %s886_s13   ;;  %s606_s12 = sphi %s642_s12, %s885_s12   ;;  %s602_s11 = sphi %s640_s11, %s884_s11   ;;  %s598_s10 = sphi %s638_s10, %s883_s10   ;;  %s594_s9 = sphi %s636_s9, %s882_s9  }
   0x9   : > { %s33_s17 = sadd.s32 1, %s610_s13  ;;  %s42_s18 = sadd.s32 1, %s602_s11 }
   0xa   : > { %p35_p0 = scmp.ge.s32.totalorder %s33_s17, 2  ;;  %p49_p1 = scmp.ne.s32.totalorder %s602_s11, %s598_s10 }
   0xb   : > { %p50_p2 = scmp.eq.s32.totalorder %s614_s14, 0  ;;  %p55_p3 = scmp.ne.s32.totalorder %s598_s10, %s594_s9 }
   0xc   : > { %s888_s17 = smov (%p35_p0, %s33_s17), 0  ;;  %p56_p5 = scmp.eq.s32.totalorder %s377_s15, 0 }
   0xd   : > { %p677_p4 = por %p50_p2, %p49_p1  ;;  %s37_s20 = ssub.s32 %s610_s13, %s888_s17 }
   0xe   : > { %p109_p6 = scmp.eq.s32.totalorder %s377_s15, 1  ;;  %p40_p7 = scmp.eq.s32.totalorder %s37_s20, 0 }
   0xf   : > { %p683_p8 = por %p56_p5, %p55_p3  ;;  %p115_p10 = scmp.eq.s32.totalorder %s378_s16, 1 }
  0x10   : > { %p687_p9 = por %p109_p6, %p49_p1  ;;  %p414_p13 = scmp.lt.s32.totalorder %s614_s14, 2 }
  0x11   : > { %s872_s21 = scalar_select %p683_p8, 1, 0 }
  0x12   : > { %s873_s22 = scalar_select %p687_p9, 1, 0 }
  0x13   : > { %s692_s23 = scalar_select %p40_p7, %s602_s11, %s42_s18  }
  0x14   : > { %p694_p11 = por %p115_p10, %p55_p3  ;;  %s701_s25 = sand.u32 1, %s602_s11  }
  0x15   : > { %s381_s26 = sshll.u32 %s701_s25, 4  ;;  %s395_s27 = sshll.u32 %s610_s13, 8 }
  0x16   : > { %s874_s24 = scalar_select %p694_p11, 1, 0 }
  0x17   : > { %s708_s30 = scalar_lea.hbm %s866_s0, %s395_s27  ;;  %s139_s3 = scalar_lea.vmem [#allocation2], %s381_s26 }
  0x18   : > { %s147_s4 = sshll.u32 %s139_s3, 4  ;;  %p714_p0 = pnand %p414_p13, %p677_p4  ;;  %s710_s4 = int_to_ptr.vmem [resolvable:$true] %s147_s4 }
  0x19   : > { %s136_s6 = scalar_lea.sflag [#allocation3], %s701_s25  ;;  %s468_s7 = scalar_lea.hbm %s708_s30, 256 }
  0x1a   : > { %p469_p2 = scmp.ne.s32.totalorder %s708_s30, %s468_s7  ;;  %p470_p3 = pneg %p714_p0 }
  0x1b   : > { %s473_s16 = scalar_lea.hbm %s866_s0, 512  ;;  %p474_p4 = scmp.lt.u32.totalorder %s708_s30, %s866_s0 }
  0x1c   : > { %p471_p5 = pnand %p470_p3, %p469_p2  ;;  %p475_p7 = scmp.lt.u32.totalorder %s473_s16, %s468_s7 }
  0x1d   : > { %p477_p13 = scmp.lt.u32.totalorder %s468_s7, %s708_s30 }
  0x1e   : > { %p472_p6 = pneg %p471_p5  ;;  %p476_p10 = por %p475_p7, %p474_p4 }
  0x20   : > { %p478_p12 = por %p477_p13, %p476_p10 }
  0x22   : > { %p479_p1 = pnand %p478_p12, %p472_p6 }
  0x24   : > { %482 = shalt.err (!%p479_p1)
}
  0x25   : > { %s483_s20 = scalar_lea.vmem %s710_s4, 256  ;;  %s616_s26 = smov [#allocation2]  }
  0x26   : > { %p484_p2 = scmp.ne.s32.totalorder %s710_s4, %s483_s20  ;;  %s488_s27 = sshll.u32 %s616_s26, 4  ;;  %s489_s27 = int_to_ptr.vmem [resolvable:$false] %s488_s27 }
  0x27   : > { %s490_s28 = scalar_lea.vmem %s489_s27, 512  ;;  %p491_p9 = scmp.lt.s32.totalorder %s710_s4, %s489_s27 }
  0x28   : > { %p486_p5 = pnand %p484_p2, %p470_p3  ;;  %p492_p4 = scmp.lt.s32.totalorder %s490_s28, %s483_s20 }
  0x2a   : > { %p487_p11 = pneg %p486_p5  ;;  %p493_p7 = por %p492_p4, %p491_p9 }
  0x2c   : > { %p494_p10 = pnand %p493_p7, %p487_p11 }
  0x2e   : > { %497 = shalt.err (!%p494_p10)
}
  0x2f   : > { %s617_s29 = smov 128   ;;  %s618_s3 = smov 8  }
  0x30   : > { %406 = dma.hbm_to_vmem [thread:$0]  (!%p714_p0), %s708_s30, 256, %s710_s4, %s136_s6, %s617_s29, %s617_s29, %s618_s3  }
  0x31   : > { %p177_p9 = scmp.lt.s32.totalorder %s614_s14, 3  ;;  %s384_s7 = sshll.u32 %s701_s25, 5 }
  0x32   : > { %s396_s8 = sshll.u32 %s610_s13, 9  ;;  %p876_p11 = scmp.ge.s32.totalorder %s614_s14, 1 }
  0x33   : > { %s762_s19 = scalar_lea.hbm %s867_s1, %s396_s8  ;;  %s161_s20 = scalar_lea.vmem [#allocation5], %s384_s7 }
  0x34   : > { %p755_p12 = pnand %p876_p11, %p177_p9  ;;  %s169_s26 = sshll.u32 %s161_s20, 4  ;;  %s764_s26 = int_to_ptr.vmem [resolvable:$true] %s169_s26 }
  0x35   : > { %s158_s30 = scalar_lea.sflag [#allocation6], %s701_s25  ;;  %s498_s4 = scalar_lea.hbm %s762_s19, 512 }
  0x36   : > { %p499_p1 = scmp.ne.s32.totalorder %s762_s19, %s498_s4  ;;  %s503_s28 = scalar_lea.hbm %s867_s1, 1024 }
  0x37   : > { %p504_p2 = scmp.lt.u32.totalorder %s762_s19, %s867_s1  ;;  %p505_p5 = scmp.lt.u32.totalorder %s503_s28, %s498_s4 }
  0x38   : > { %p501_p6 = pnand %p499_p1, %p470_p3  ;;  %p507_p7 = scmp.lt.u32.totalorder %s498_s4, %s762_s19 }
  0x39   : > { %p506_p4 = por %p505_p5, %p504_p2 }
  0x3a   : > { %p502_p13 = pneg %p501_p6 }
  0x3b   : > { %p508_p10 = por %p507_p7, %p506_p4 }
  0x3d   : > { %p509_p9 = pnand %p508_p10, %p502_p13 }
  0x3f   : > { %512 = shalt.err (!%p509_p9)
}
  0x40   : > { %s513_s7 = scalar_lea.vmem %s764_s26, 512  ;;  %s619_s18 = smov [#allocation5]  }
  0x41   : > { %p514_p11 = scmp.ne.s32.totalorder %s764_s26, %s513_s7  ;;  %s518_s20 = sshll.u32 %s619_s18, 4  ;;  %s519_s20 = int_to_ptr.vmem [resolvable:$false] %s518_s20 }
  0x42   : > { %s520_s6 = scalar_lea.vmem %s519_s20, 1024  ;;  %p521_p8 = scmp.lt.s32.totalorder %s764_s26, %s519_s20 }
  0x43   : > { %p516_p1 = pnand %p514_p11, %p470_p3  ;;  %p522_p2 = scmp.lt.s32.totalorder %s520_s6, %s513_s7 }
  0x45   : > { %p517_p6 = pneg %p516_p1  ;;  %p523_p5 = por %p522_p2, %p521_p8 }
  0x47   : > { %p524_p4 = pnand %p523_p5, %p517_p6 }
  0x49   : > { %527 = shalt.err (!%p524_p4)
}
  0x4a   : > { %409 = dma.hbm_to_vmem [thread:$0]  (!%p714_p0), %s762_s19, 512, %s764_s26, %s158_s30, %s617_s29, %s617_s29, %s618_s3  }
  0x4b   : > { %181 = sbr.rel (%p755_p12) target bundleno = 131 (0x83), region = 28  ;;  %s798_s4 = sand.u32 (!%p755_p12), 1, %s598_s10  }
  0x4c   : > { %s388_s27 = sshll.u32 (!%p755_p12), %s798_s4, 4  ;;  %s184_s28 = scalar_lea.sflag (!%p755_p12), [#allocation3], %s798_s4 }
  0x4d   : > { %s187_s5 = scalar_lea.vmem (!%p755_p12), [#allocation2], %s388_s27  ;;  %p878_p8 = scmp.ne.s32.totalorder (!%p755_p12), %s872_s21, 0 }
  0x52   : > { %581 = dma.done.wait (%p878_p8), %s184_s28, 256  }
  0x53   : > { %583 = vsyncadd (%p878_p8), %s184_s28, 4294967040  ;;  %s389_s25 = sshll.u32 %s798_s4, 5  ;;  %s193_s29 = scalar_lea.sflag [#allocation6], %s798_s4 }
  0x54   : > { %s196_s3 = scalar_lea.vmem [#allocation5], %s389_s25 }
  0x55   : > { %585 = dma.done.wait (%p878_p8), %s193_s29, 512  }
  0x56   : > { %587 = vsyncadd (%p878_p8), %s193_s29, 4294966784  ;;  %v222_v0 = vld [vmem:[%s187_s5] sm:$0xff]  ;;  %v223_v1 = vld [vmem:[%s187_s5 + $0x8] sm:$0xff]  ;;  %v243_v14 = vlaneseq  ;;  %s390_s21 = sshll.u32 %s798_s4, 3  ;;  %s392_s26 = sshll.u32 %s606_s12, 7 }
  0x57   : > { %v224_v2 = vld [vmem:[%s196_s3] sm:$0xff]  ;;  %v225_v3 = vld [vmem:[%s196_s3 + $0x8] sm:$0xff]  ;;  %v226_v4 = vld [vmem:[%s196_s3 + $0x10] sm:$0xff]  ;;  %s221_s15 = scalar_lea.vmem [#allocation7], %s390_s21  ;;  %s819_s16 = scalar_lea.hbm %s868_s2, %s392_s26 }
  0x58   : > { %v227_v5 = vld [vmem:[%s196_s3 + $0x18] sm:$0xff]  ;;  %v228_v6 = vsub.f32 %v224_v2, %v226_v4  ;;  %v244_v16 = vshrl.u32 %v243_v14, 7  ;;  %v246_v18 = vand.u32 127, %v243_v14  ;;  %s271_s19 = sshll.u32 %s221_s15, 4  ;;  %s257_s7 = scalar_lea.sflag [#allocation4], %s798_s4  ;;  %s814_s19 = int_to_ptr.vmem [resolvable:$true] %s271_s19 }
  0x59   : > { %v229_v7 = vsub.f32 %v225_v3, %v227_v5  ;;  %s528_s18 = scalar_lea.vmem %s814_s19, 128  ;;  %p879_p3 = scmp.ne.s32.totalorder %s873_s22, 0 }
  0x5a   : > { %v230_v8 = vmul.f32 %v228_v6, %v222_v0  ;;  %v248_v19 = vmul.u32 128, %v244_v16  ;;  %p529_p0 = scmp.ne.s32.totalorder %s814_s19, %s528_s18  ;;  %s620_s12 = smov [#allocation7]  }
  0x5b   : > { %v231_v9 = vmul.f32 %v229_v7, %v223_v1  ;;  %s532_s20 = sshll.u32 %s620_s12, 4  ;;  %s533_s20 = int_to_ptr.vmem [resolvable:$false] %s532_s20 }
  0x5c   : > { %v232_v10 = vadd.f32 %v230_v8, %v226_v4  ;;  %v251_v21 = vadd.s32 %v248_v19, %v246_v18  ;;  %p530_p12 = pnand %p529_p0, %p879_p3  ;;  %s534_s6 = scalar_lea.vmem %s533_s20, 256 }
  0x5d   : > { %v233_v11 = vadd.f32 %v231_v9, %v227_v5  ;;  %p535_p7 = scmp.lt.s32.totalorder %s814_s19, %s533_s20  ;;  %p536_p10 = scmp.lt.s32.totalorder %s534_s6, %s528_s18 }
  0x5e   : > { %vm252_vm0 = vcmp.lt.s32.totalorder %v251_v21, 256  ;;  %p531_p13 = pneg %p530_p12 }
  0x5f   : > { %v234_v12 = vadd.f32 %v233_v11, %v232_v10  ;;  %p537_p9 = por %p536_p10, %p535_p7 }
  0x61   : > { %v235_v13 = vmax.f32 %v234_v12, 1e-12  ;;  %v237_v17 = vsub.f32 1.0, %v234_v12  ;;  %p538_p11 = pnand %p537_p9, %p531_p13 }
  0x63   : > { %v236_v15 = vmin.f32 %v235_v13, 1.0  ;;  %v238_v20 = vmul.f32 %v237_v17, %v237_v17 }
  0x65   : > { %466 = vlog2.f32 %v236_v15  ;;  %v239_v22 = vmul.f32 -0.36067376, %v238_v20 }
  0x6f   : > { %v467_v23 = vpop.eup %466 }
  0x70   : > { %v241_v24 = vmul.f32 0.6931472, %v467_v23 }
  0x72   : > { %v242_v25 = vmul.f32 %v241_v24, %v239_v22 }
  0x74   : > { %v253_v26 = vsel %vm252_vm0, %v242_v25, 0.0 }
  0x75   : > { %255 = vst [vmem:[%s221_s15] sm:$0xff] %v253_v26 }
  0x76   : > { %541 = shalt.err (!%p538_p11)
}
  0x77   : > { %s542_s4 = scalar_lea.hbm %s819_s16, 128  ;;  %s546_s5 = scalar_lea.hbm %s868_s2, 256 }
  0x78   : > { %p543_p1 = scmp.ne.s32.totalorder %s819_s16, %s542_s4  ;;  %p547_p5 = scmp.lt.u32.totalorder %s819_s16, %s868_s2 }
  0x79   : > { %p548_p4 = scmp.lt.u32.totalorder %s546_s5, %s542_s4  ;;  %p550_p0 = scmp.lt.u32.totalorder %s542_s4, %s819_s16 }
  0x7a   : > { %p544_p6 = pnand %p543_p1, %p879_p3 }
  0x7b   : > { %p549_p8 = por %p548_p4, %p547_p5 }
  0x7c   : > { %p545_p2 = pneg %p544_p6 }
  0x7d   : > { %p551_p12 = por %p550_p0, %p549_p8 }
  0x7f   : > { %p552_p13 = pnand %p551_p12, %p545_p2 }
  0x81   : > { %555 = shalt.err (!%p552_p13)
}
  0x82   : > { %401 = dma.vmem_to_hbm [thread:$0]  (%p879_p3), %s814_s19, 128, %s819_s16, %s257_s7  }
  0x83 PF: > { %s283_s3 = sand.u32 1, %s594_s9   ;;  %p880_p7 = scmp.ne.s32.totalorder %s874_s24, 0 }
  0x84   : > { %p881_p10 = scmp.ge.s32.totalorder %s614_s14, 2  ;;  %s284_s21 = scalar_lea.sflag [#allocation4], %s283_s3 }
  0x86   : > { %p411_p9 = pnand %p881_p10, %p880_p7 }
  0x88   : > { %589 = dma.done.wait (!%p411_p9), %s284_s21, 128  }
  0x89   : > { %591 = vsyncadd (!%p411_p9), %s284_s21, 4294967168  ;;  %s21_s14 = sadd.s32 1, %s614_s14   ;;  %s882_s9 = smov %s598_s10 }
  0x8a   : > { %p18_p11 = scmp.ge.s32.totalorder %s21_s14, 4   ;;  %s883_s10 = smov %s602_s11 }
  0x8b   : > { %s884_s11 = smov %s692_s23  ;;  %s885_s12 = smov %s610_s13 }
  0x8c   : > { %s886_s13 = smov %s888_s17  ;;  %20 = sbr.rel (!%p18_p11) target bundleno = 8 (0x8), region = 86 }
  0x93   :  { %289 = vsyncpa [#allocation3], 1 }
  0x94   :  { %291 = vsyncpa [#allocation3 + $0x1], 1 }
  0x95   :  { %292 = vsyncpa [#allocation6], 1 }
  0x96   :  { %294 = vsyncpa [#allocation6 + $0x1], 1 }
  0x97   :  { %295 = vsyncpa [#allocation4], 1 }
  0x98   :  { %297 = vsyncpa [#allocation4 + $0x1], 1 }

</bundles_post_ra>
